<compile_context>
chip_gen: v5e
topology: v5e:2x2
jax: 0.10.0
libtpu: 0.0.40
codegen_flags: <defaults>
</compile_context>

<pallas_src>
import functools

import jax
import jax.numpy as jnp
from jax.experimental import pallas as pl
from jax.experimental.pallas import tpu as pltpu


def _make_shift(h, w):
    """Returns shift(x, di, dj) with shift(x)[i, j] == x[i + di, j + dj]
    (wrap-around values are masked out by the caller)."""
    aligned = (h % 8 == 0) and (w % 128 == 0)

    def shift(x, di=0, dj=0):
        if aligned:
            # XLU rotate path: full (8,128) vregs, no relayout copies.
            if di:
                x = pltpu.roll(x, shift=(-di) % h, axis=0)
            if dj:
                x = pltpu.roll(x, shift=(-dj) % w, axis=1)
        else:
            # Tile-unaligned fallback (small fields): same full-tile + mask
            # structure, just without the hardware-rotate fast path.
            if di:
                x = jnp.roll(x, -di, axis=0)
            if dj:
                x = jnp.roll(x, -dj, axis=1)
        return x

    return shift


def _energy_kernel(d_ref, o_ref, acc_ref, *, energy_type, h, w, scale):
    n = pl.program_id(0)

    @pl.when(n == 0)
    def _init():
        acc_ref[...] = jnp.zeros_like(acc_ref)

    d = d_ref[0].astype(jnp.float32)          # (H, W) slice for this grid step
    shift = _make_shift(h, w)

    row = jax.lax.broadcasted_iota(jnp.int32, (h, w), 0)
    col = jax.lax.broadcasted_iota(jnp.int32, (h, w), 1)

    if energy_type == "bending":
        # Fused 5-point second-derivative stencils (un-normalized; the 1/4 per
        # derivative is folded into `scale`).
        dxx = shift(d, di=2) + shift(d, di=-2) - 2.0 * d
        dyy = shift(d, dj=2) + shift(d, dj=-2) - 2.0 * d
        a = shift(d, di=1) - shift(d, di=-1)      # row central difference
        dxy = shift(a, dj=1) - shift(a, dj=-1)    # then column difference
        e = dxx * dxx + dyy * dyy + 2.0 * (dxy * dxy)
        lo, hi_r, hi_c = 2, h - 3, w - 3
    else:
        dx = shift(d, di=1) - shift(d, di=-1)     # un-normalized central diff
        dy = shift(d, dj=1) - shift(d, dj=-1)
        if energy_type == "gradient-l2":
            e = dx * dx + dy * dy
        else:  # gradient-l1
            e = jnp.abs(dx) + jnp.abs(dy)
        lo, hi_r, hi_c = 1, h - 2, w - 2

    interior = (row >= lo) & (row <= hi_r) & (col >= lo) & (col <= hi_c)
    acc_ref[...] += jnp.where(interior, e, 0.0)

    @pl.when(n == pl.num_programs(0) - 1)
    def _finalize():
        # One deferred cross-lane/sublane reduction + one scalar normalization.
        o_ref[0, 0] = jnp.sum(acc_ref[...]) * scale


def displacement_regularizer_2d(disp, energy_type="gradient-l2"):
    """disp: [B, C>=2, H, W]; uses channels 0 and 1 (exactly like the PyTorch
    module's gradient_txyz). Returns a scalar float32 energy."""
    B, C, H, W = disp.shape
    N = B * 2

    if energy_type == "bending":
        if H < 5 or W < 5:
            raise ValueError("bending energy requires H >= 5 and W >= 5")
        # true e = e_unscaled / 16 ; mean over N*(H-4)*(W-4)
        denom = 16.0 * N * (H - 4) * (W - 4)
        flops_per_elem = 16
    elif energy_type == "gradient-l2":
        if H < 3 or W < 3:
            raise ValueError("gradient energy requires H >= 3 and W >= 3")
        # true e = e_unscaled / 4 ; mean over N*(H-2)*(W-2) ; then / 2
        denom = 8.0 * N * (H - 2) * (W - 2)
        flops_per_elem = 8
    elif energy_type == "gradient-l1":
        if H < 3 or W < 3:
            raise ValueError("gradient energy requires H >= 3 and W >= 3")
        # true e = e_unscaled / 2 ; mean ; then / 2
        denom = 4.0 * N * (H - 2) * (W - 2)
        flops_per_elem = 8
    else:
        raise ValueError("Not recognised local regulariser!")

    d = disp[:, :2].reshape(N, H, W)

    kernel = functools.partial(
        _energy_kernel, energy_type=energy_type, h=H, w=W, scale=1.0 / denom)

    # VMEM budget: double-buffered input block + f32 accumulator + headroom for
    # the shifted temporaries; clamped to a range safe on v5e/v6e/v7x.
    est = H * W * (2 * d.dtype.itemsize + 4 + 36) + (2 << 20)
    vmem_limit = int(min(max(est, 32 << 20), 48 << 20))

    cost = pl.CostEstimate(
        flops=flops_per_elem * N * H * W,
        transcendentals=0,
        bytes_accessed=d.size * d.dtype.itemsize + 4,
    )

    out = pl.pallas_call(
        kernel,
        out_shape=jax.ShapeDtypeStruct((1, 1), jnp.float32),
        grid_spec=pltpu.PrefetchScalarGridSpec(
            num_scalar_prefetch=0,
            grid=(N,),
            in_specs=[pl.BlockSpec((1, H, W), lambda n: (n, 0, 0))],
            out_specs=pl.BlockSpec((1, 1), lambda n: (0, 0),
                                   memory_space=pltpu.MemorySpace.SMEM),
            scratch_shapes=[pltpu.VMEM((H, W), jnp.float32)],
        ),
        # Single reduction axis (constant output block index) => "arbitrary".
        # (Per-slice partial sums + "parallel" would enable v7x megacore; the
        # global-accumulator form is kept for the single-scalar output.)
        compiler_params=pltpu.CompilerParams(
            dimension_semantics=("arbitrary",),
            vmem_limit_bytes=vmem_limit,
        ),
        cost_estimate=cost,
    )(d)
    return out[0, 0]


# ---- pure-JAX reference (mirrors the PyTorch code exactly) -------------------
def _ref_energy(disp, energy_type):
    def gdx(fv):
        return (fv[:, 2:, 1:-1] - fv[:, :-2, 1:-1]) / 2

    def gdy(fv):
        return (fv[:, 1:-1, 2:] - fv[:, 1:-1, :-2]) / 2

    def gtxyz(T, fn):
        return jnp.stack([fn(T[:, i]) for i in (0, 1)], axis=1)

    dTdx = gtxyz(disp, gdx)
    dTdy = gtxyz(disp, gdy)
    if energy_type == "bending":
        dTdxx = gtxyz(dTdx, gdx)
        dTdyy = gtxyz(dTdy, gdy)
        dTdxy = gtxyz(dTdx, gdy)
        return jnp.mean(dTdxx ** 2 + dTdyy ** 2 + 2 * dTdxy ** 2)
    if energy_type == "gradient-l2":
        return jnp.mean(dTdx ** 2 + dTdy ** 2) / 2.0
    if energy_type == "gradient-l1":
        return jnp.mean(jnp.abs(dTdx) + jnp.abs(dTdy)) / 2.0
    raise ValueError(energy_type)


if __name__ == "__main__":
    key = jax.random.PRNGKey(0)
    # Two deterministic test fields:
    #   (2, 2, 16, 16)  -> tile-unaligned fallback path (jnp.roll shifts)
    #   (2, 2, 16, 128) -> (8,128)-aligned fast path (pltpu.roll / XLU rotates)
    shapes = [(2, 2, 16, 16), (2, 2, 16, 128)]
    for idx, shp in enumerate(shapes):
        disp = jax.random.normal(jax.random.fold_in(key, idx), shp,
                                 dtype=jnp.float32)
        for etype in ("gradient-l2", "gradient-l1", "bending"):
            out = jax.block_until_ready(
                displacement_regularizer_2d(disp, energy_type=etype))
            ref = _ref_energy(disp, etype)
            assert jnp.allclose(out, ref, rtol=1e-4, atol=1e-6), \
                (shp, etype, float(out), float(ref))
    print("KERNEL_OK")
</pallas_src>

<mosaic_0001>
module attributes {stable_mosaic.version = 11 : i64} {
  func.func @_energy_kernel(%arg0: i32, %arg1: memref<1x16x16xf32, #tpu.memory_space<vmem>>, %arg2: memref<1x1xf32, #tpu.memory_space<smem>>, %arg3: memref<16x16xf32, #tpu.memory_space<vmem>>) attributes {dimension_semantics = [#tpu.dimension_semantics<arbitrary>], iteration_bounds = array<i64: 4>, scalar_prefetch = 0 : i64, scratch_operands = 1 : i64, tpu.core_type = #tpu.core_type<tc>, window_params = [{transform_indices = @transform_0, window_bounds = array<i64: 1, 16, 16>}, {transform_indices = @transform_1, window_bounds = array<i64: 1, 1>}]} {
    %c0_i32 = arith.constant 0 : i32
    %0 = arith.cmpi eq, %arg0, %c0_i32 : i32
    %1 = arith.extui %0 : i1 to i32
    %c0_i32_0 = arith.constant 0 : i32
    %2 = arith.cmpi ne, %1, %c0_i32_0 : i32
    scf.if %2 {
      %cst_10 = arith.constant 0.000000e+00 : f32
      %43 = vector.broadcast %cst_10 : f32 to vector<16x16xf32>
      %c0_11 = arith.constant 0 : index
      %c0_12 = arith.constant 0 : index
      %44 = vector.load %arg3[%c0_11, %c0_12] : memref<16x16xf32, #tpu.memory_space<vmem>>, vector<16x16xf32>
      tpu.vector_store %arg3[%c0_11, %c0_12], %43 {strides = array<i32>} : memref<16x16xf32, #tpu.memory_space<vmem>>, vector<16x16xf32>,
    } else {
    }
    %c0 = arith.constant 0 : index
    %c0_1 = arith.constant 0 : index
    %c0_2 = arith.constant 0 : index
    %3 = vector.load %arg1[%c0, %c0_1, %c0_2] : memref<1x16x16xf32, #tpu.memory_space<vmem>>, vector<1x16x16xf32>
    %4 = vector.shape_cast %3 : vector<1x16x16xf32> to vector<16x16xf32>
    %5 = tpu.iota {dimensions = array<i32: 0>} : vector<16x16xi32>
    %6 = tpu.iota {dimensions = array<i32: 1>} : vector<16x16xi32>
    %7 = vector.extract_strided_slice %4 {offsets = [1, 0], sizes = [15, 16], strides = [1, 1]} : vector<16x16xf32> to vector<15x16xf32>
    %8 = vector.extract_strided_slice %4 {offsets = [0, 0], sizes = [1, 16], strides = [1, 1]} : vector<16x16xf32> to vector<1x16xf32>
    %9 = tpu.concatenate %7, %8 in 0 : vector<15x16xf32>, vector<1x16xf32> -> vector<16x16xf32>
    %10 = vector.extract_strided_slice %4 {offsets = [15, 0], sizes = [1, 16], strides = [1, 1]} : vector<16x16xf32> to vector<1x16xf32>
    %11 = vector.extract_strided_slice %4 {offsets = [0, 0], sizes = [15, 16], strides = [1, 1]} : vector<16x16xf32> to vector<15x16xf32>
    %12 = tpu.concatenate %10, %11 in 0 : vector<1x16xf32>, vector<15x16xf32> -> vector<16x16xf32>
    %13 = arith.subf %9, %12 : vector<16x16xf32>
    %14 = vector.extract_strided_slice %4 {offsets = [0, 1], sizes = [16, 15], strides = [1, 1]} : vector<16x16xf32> to vector<16x15xf32>
    %15 = vector.extract_strided_slice %4 {offsets = [0, 0], sizes = [16, 1], strides = [1, 1]} : vector<16x16xf32> to vector<16x1xf32>
    %16 = tpu.concatenate %14, %15 in 1 : vector<16x15xf32>, vector<16x1xf32> -> vector<16x16xf32>
    %17 = vector.extract_strided_slice %4 {offsets = [0, 15], sizes = [16, 1], strides = [1, 1]} : vector<16x16xf32> to vector<16x1xf32>
    %18 = vector.extract_strided_slice %4 {offsets = [0, 0], sizes = [16, 15], strides = [1, 1]} : vector<16x16xf32> to vector<16x15xf32>
    %19 = tpu.concatenate %17, %18 in 1 : vector<16x1xf32>, vector<16x15xf32> -> vector<16x16xf32>
    %20 = arith.subf %16, %19 : vector<16x16xf32>
    %21 = arith.mulf %13, %13 : vector<16x16xf32>
    %22 = arith.mulf %20, %20 : vector<16x16xf32>
    %23 = arith.addf %21, %22 : vector<16x16xf32>
    %c1_i32 = arith.constant 1 : i32
    %24 = vector.broadcast %c1_i32 : i32 to vector<16x16xi32>
    %25 = arith.cmpi sge, %5, %24 : vector<16x16xi32>
    %c14_i32 = arith.constant 14 : i32
    %26 = vector.broadcast %c14_i32 : i32 to vector<16x16xi32>
    %27 = arith.cmpi sle, %5, %26 : vector<16x16xi32>
    %28 = arith.andi %25, %27 : vector<16x16xi1>
    %c1_i32_3 = arith.constant 1 : i32
    %29 = vector.broadcast %c1_i32_3 : i32 to vector<16x16xi32>
    %30 = arith.cmpi sge, %6, %29 : vector<16x16xi32>
    %31 = arith.andi %28, %30 : vector<16x16xi1>
    %c14_i32_4 = arith.constant 14 : i32
    %32 = vector.broadcast %c14_i32_4 : i32 to vector<16x16xi32>
    %33 = arith.cmpi sle, %6, %32 : vector<16x16xi32>
    %34 = arith.andi %31, %33 : vector<16x16xi1>
    %c0_5 = arith.constant 0 : index
    %c0_6 = arith.constant 0 : index
    %35 = vector.load %arg3[%c0_5, %c0_6] : memref<16x16xf32, #tpu.memory_space<vmem>>, vector<16x16xf32>
    %cst = arith.constant 0.000000e+00 : f32
    %36 = vector.broadcast %cst : f32 to vector<16x16xf32>
    %37 = arith.select %34, %23, %36 : vector<16x16xi1>, vector<16x16xf32>
    %38 = arith.addf %35, %37 : vector<16x16xf32>
    %c0_7 = arith.constant 0 : index
    %c0_8 = arith.constant 0 : index
    %39 = vector.load %arg3[%c0_7, %c0_8] : memref<16x16xf32, #tpu.memory_space<vmem>>, vector<16x16xf32>
    tpu.vector_store %arg3[%c0_7, %c0_8], %38 {strides = array<i32>} : memref<16x16xf32, #tpu.memory_space<vmem>>, vector<16x16xf32>,
    %c3_i32 = arith.constant 3 : i32
    %40 = arith.cmpi eq, %arg0, %c3_i32 : i32
    %41 = arith.extui %40 : i1 to i32
    %c0_i32_9 = arith.constant 0 : i32
    %42 = arith.cmpi ne, %41, %c0_i32_9 : i32
    scf.if %42 {
      %c0_10 = arith.constant 0 : index
      %c0_11 = arith.constant 0 : index
      %43 = vector.load %arg3[%c0_10, %c0_11] : memref<16x16xf32, #tpu.memory_space<vmem>>, vector<16x16xf32>
      %44 = vector.shape_cast %43 : vector<16x16xf32> to vector<1x16x16xf32>
      %cst_12 = arith.constant dense<0.000000e+00> : vector<1xf32>
      %45 = vector.multi_reduction <add>, %44, %cst_12 [1, 2] : vector<1x16x16xf32> to vector<1xf32>
      %46 = vector.shape_cast %45 : vector<1xf32> to vector<1x1x1xf32>
      %47 = vector.extract %46[0, 0, 0] : f32 from vector<1x1x1xf32>
      %cst_13 = arith.constant 1.59438772E-4 : f32
      %48 = arith.mulf %47, %cst_13 : f32
      %c0_14 = arith.constant 0 : index
      %c0_15 = arith.constant 0 : index
      %49 = memref.load %arg2[%c0_14, %c0_15] : memref<1x1xf32, #tpu.memory_space<smem>>
      memref.store %48, %arg2[%c0_14, %c0_15] : memref<1x1xf32, #tpu.memory_space<smem>>
    } else {
    }
    return
  }
  func.func @transform_0(%arg0: i32) -> (i32, i32, i32) {
    %c0_i32 = arith.constant 0 : i32
    %c0_i32_0 = arith.constant 0 : i32
    %c0_i32_1 = arith.constant 0 : i32
    return %arg0, %c0_i32, %c0_i32_0 : i32, i32, i32
  }
  func.func @transform_1(%arg0: i32) -> (i32, i32) {
    %c0_i32 = arith.constant 0 : i32
    %c0_i32_0 = arith.constant 0 : i32
    %c0_i32_1 = arith.constant 0 : i32
    return %c0_i32, %c0_i32_0 : i32, i32
  }
}

</mosaic_0001>

<bundles_post_ra>
// kernel: tpu_custom_call.1
= control target key start
LH: loop header
LB: loop body
LE: loop exit
PB: predicated region body
PF: predicated region fallthrough
CT: control target
= control target key end

     0   :  { %6 = vsyncpa [#allocation4], 0  ;;  %s564_s0 = inlined_call_operand.hbm [shape: f32[4,16,16], index: 0, kind: input, shape index: {}]   ;;  %s565_s1 = inlined_call_operand.hbm [shape: f32[1,1], index: 1, kind: output, shape index: {}]  }
   0x1   :  { %8 = vsyncpa [#allocation4 + $0x1], 0 }
   0x2   :  { %9 = vsyncpa [#allocation5], 0  ;;  %s469_s6 = smov 0   ;;  %s471_s7 = smov 0  }
   0x3   :  { %s473_s8 = smov 0   ;;  %s475_s9 = smov 0  }
   0x4 LB: > { %s488_s10 = sadd.s32 4294967295, %s449_s9   ;;  %s491_s11 = sadd.s32 1, %s449_s9   ;;  %s449_s9 = sphi %s475_s9, %s572_s9   ;;  %s445_s8 = sphi %s473_s8, %s571_s8   ;;  %s441_s7 = sphi %s471_s7, %s570_s7   ;;  %s437_s6 = sphi %s469_s6, %s569_s6  }
   0x5   : > { %s19_s12 = ssub.s32 %s449_s9, %s491_s11  ;;  %s22_s13 = sadd.s32 1, %s445_s8 }
   0x6   : > { %p20_p0 = scmp.eq.s32.totalorder %s19_s12, 0  ;;  %p29_p1 = scmp.ne.s32.totalorder %s445_s8, %s441_s7 }
   0x7   : > { %p30_p2 = scmp.eq.s32.totalorder %s449_s9, 0  ;;  %p35_p3 = scmp.ne.s32.totalorder %s441_s7, %s437_s6 }
   0x8   : > { %s501_s14 = scalar_select %p20_p0, %s445_s8, %s22_s13  }
   0x9   : > { %p503_p4 = por %p30_p2, %p29_p1  ;;  %p36_p5 = scmp.eq.s32.totalorder %s488_s10, 0 }
   0xa   : > { %p324_p6 = scmp.lt.s32.totalorder %s449_s9, 4  ;;  %s80_s17 = sand.u32 1, %s445_s8  }
   0xb   : > { %p509_p7 = por %p36_p5, %p35_p3  ;;  %s300_s18 = sshll.u32 %s80_s17, 4 }
   0xc   : > { %s311_s19 = sshll.u32 %s449_s9, 4  ;;  %s84_s23 = scalar_lea.vmem [#allocation3], %s300_s18 }
   0xd   : > { %s89_s22 = scalar_lea.hbm %s564_s0, %s311_s19  ;;  %s92_s24 = sshll.u32 %s84_s23, 4  ;;  %s93_s24 = int_to_ptr.vmem [resolvable:$true] %s92_s24 }
   0xe   : > { %s90_s25 = sshll.u32 %s89_s22, 4  ;;  %p520_p8 = pnand %p324_p6, %p503_p4  ;;  %s91_s25 = int_to_ptr.hbm [resolvable:$true] %s90_s25 }
   0xf   : > { %p303_p9 = scmp.ge.s32.totalorder %s449_s9, 1  ;;  %s81_s27 = scalar_lea.sflag [#allocation4], %s80_s17 }
  0x10   : > { %s367_s28 = sshra.s32 %s91_s25, 4  ;;  %p371_p11 = pneg %p520_p8  ;;  %s368_s28 = int_to_ptr.hbm [resolvable:$true] %s367_s28 }
  0x11   : > { %s369_s29 = scalar_lea.hbm %s368_s28, 16  ;;  %s374_s3 = scalar_lea.hbm %s564_s0, 64 }
  0x12   : > { %p370_p10 = scmp.ne.s32.totalorder %s368_s28, %s369_s29  ;;  %p375_p0 = scmp.lt.s32.totalorder %s368_s28, %s564_s0 }
  0x13   : > { %p376_p1 = scmp.lt.s32.totalorder %s374_s3, %s369_s29 }
  0x14   : > { %p372_p12 = pnand %p371_p11, %p370_p10 }
  0x15   : > { %p377_p2 = por %p376_p1, %p375_p0 }
  0x16   : > { %p373_p13 = pneg %p372_p12 }
  0x18   : > { %p378_p3 = pnand %p377_p2, %p373_p13 }
  0x1a   : > { %381 = shalt.err (!%p378_p3)
}
  0x1b   : > { %s451_s6 = smov 128   ;;  %s452_s12 = smov 8  }
  0x1c   : > { %323 = dma.hbm_to_vmem [thread:$0]  (!%p520_p8), %s91_s25, 256, %s93_s24, %s81_s27, %s451_s6, %s451_s6, %s452_s12  }
  0x1d   : > { %p100_p4 = scmp.lt.s32.totalorder %s449_s9, 5 }
  0x1f   : > { %p101_p5 = pnand %p303_p9, %p100_p4 }
  0x20   : > { %s106_s13 = sand.u32 (!%p101_p5), 1, %s441_s7  }
  0x21   : > { %104 = sbr.rel (%p101_p5) target bundleno = 390 (0x186), region = 24  ;;  %s304_s15 = sshll.u32 (!%p101_p5), %s106_s13, 4 }
  0x22   : > { %s107_s17 = scalar_lea.sflag (!%p101_p5), [#allocation4], %s106_s13  ;;  %s110_s18 = scalar_lea.vmem (!%p101_p5), [#allocation3], %s304_s15 }
  0x26   : > { %428 = dma.done.wait (%p509_p7), %s107_s17, 256  }
  0x27   : > { %430 = vsyncadd (%p509_p7), %s107_s17, 4294967040  ;;  %p305_p6 = scmp.ne.s32.totalorder %s488_s10, 0 }
  0x29   : > { %128 = sbr.rel (%p305_p6) target bundleno = 49 (0x31), region = 32 }
  0x2e   : > { %vm129_vm0 = vcmask 130048   ;;  %v453_v0 = vmov 0.0  }
  0x2f   : > { %130 = vst.msk [vmem:[#allocation2] sm:$0xff] %vm129_vm0, %v453_v0 }
  0x30   : > { %131 = vst.msk [vmem:[#allocation2 + $0x8] sm:$0xff] %vm129_vm0, %v453_v0 }
  0x31 PF: > { %v132_v1 = vld [vmem:[%s110_s18] sm:$0xff]  ;;  %s454_s9 = smov 15   ;;  %s455_s19 = smov 127   ;;  %v133_v2 = vld [vmem:[%s110_s18 + $0x8] sm:$0xff]  ;;  %v134_v5 = vlaneseq  ;;  %vm141_vm1 = vcmask 1046528   ;;  %vm151_vm2 = vcmask 1040384  }
  0x32   : > { %165 = vrot.lane.b32.xlu1 %v132_v1, %s454_s9  ;;  %159 = vrot.lane.b32.xlu0 %v132_v1, %s455_s19  ;;  %s456_s20 = smov 113   ;;  %s457_s16 = smov 1   ;;  %v143_v8 = vrot.slane %v133_v2, 1  ;;  %v149_v9 = vrot.slane %v133_v2, 7  ;;  %v142_v10 = vrot.slane %v132_v1, 1  ;;  %v152_v11 = vrot.slane %v132_v1, 7 }
  0x33   : > { %174 = vrot.lane.b32.xlu2 %v132_v1, %s456_s20  ;;  %v135_v7 = vshrl.u32 %v134_v5, 7  ;;  %v138_v15 = vand.u32 127, %v134_v5  ;;  %vm171_vm3 = vcmask 121856   ;;  %vm186_vm4 = vcmask 7168   ;;  %p306_p7 = scmp.ne.s32.totalorder %s488_s10, 3 }
  0x34   : > { %v148_v16 = vsel %vm141_vm1, %v143_v8, %v142_v10  ;;  %v153_v17 = vsel %vm151_vm2, %v152_v11, %v149_v9  ;;  %v144_v18 = vsel %vm141_vm1, %v142_v10, %v143_v8  ;;  %v156_v19 = vsel %vm151_vm2, %v149_v9, %v152_v11 }
  0x35   : > { %v136_v14 = vadd.s32 8, %v135_v7  ;;  %vm203_vm6 = vcmp.ge.s32.totalorder %v138_v15, 1  ;;  %v158_v21 = vsub.f32 %v148_v16, %v153_v17  ;;  %v157_v22 = vsub.f32 %v144_v18, %v156_v19 }
  0x36   : > { %vm197_vm7 = vcmp.ge.s32.totalorder %v135_v7, 1  ;;  %vm206_vm8 = vcmp.le.s32.totalorder %v138_v15, 14  ;;  %v209_v37 = vld [vmem:[#allocation2] sm:$0xff]  ;;  %vm215_vm13 = vcmask 130048  }
  0x37   : > { %vm200_vm5 = vcmp.le.s32.totalorder %v136_v14, 14  ;;  %v192_v30 = vmul.f32 %v158_v21, %v158_v21  ;;  %vm204_vm10 = vmand %vm197_vm7, %vm203_vm6  ;;  %v191_v32 = vmul.f32 %v157_v22, %v157_v22  ;;  %v210_v35 = vld [vmem:[#allocation2 + $0x8] sm:$0xff] }
  0x38   : > { %vm205_vm9 = vmand %vm200_vm5, %vm203_vm6 }
  0x39   : > { %vm208_vm11 = vmand %vm205_vm9, %vm206_vm8 }
  0x3a   : > { %167 = vrot.lane.b32.xlu1 %v133_v2, %s454_s9  ;;  %161 = vrot.lane.b32.xlu0 %v133_v2, %s455_s19  ;;  %vm207_vm12 = vmand %vm204_vm10, %vm206_vm8 }
  0x3b   : > { %176 = vrot.lane.b32.xlu2 %v133_v2, %s456_s20 }
  0x42   : > { %182 = vrot.lane.b32.xlu1 %v133_v2, %s457_s16  ;;  %180 = vrot.lane.b32.xlu0 %v132_v1, %s457_s16 }
  0x8d   : > { %v175_v6 = vpop.permute.xlu2 %174 }
  0x95   : > { %v177_v20 = vpop.permute.xlu2 %176 }
  0xa4   : > { %v166_v3 = vpop.permute.xlu1 %165  ;;  %v160_v4 = vpop.permute.xlu0 %159 }
  0xa5   : > { %v172_v25 = vsel %vm171_vm3, %v160_v4, %v166_v3 }
  0xac   : > { %v168_v12 = vpop.permute.xlu1 %167  ;;  %v162_v13 = vpop.permute.xlu0 %161 }
  0xad   : > { %v173_v26 = vsel %vm171_vm3, %v162_v13, %v168_v12 }
  0xb4   : > { %v183_v23 = vpop.permute.xlu1 %182  ;;  %v181_v24 = vpop.permute.xlu0 %180 }
  0xb5   : > { %v188_v27 = vsel %vm186_vm4, %v177_v20, %v183_v23  ;;  %v187_v28 = vsel %vm186_vm4, %v175_v6, %v181_v24 }
  0xb6   : > { %v190_v29 = vsub.f32 %v173_v26, %v188_v27  ;;  %v189_v31 = vsub.f32 %v172_v25, %v187_v28 }
  0xb8   : > { %v194_v33 = vmul.f32 %v190_v29, %v190_v29  ;;  %v193_v34 = vmul.f32 %v189_v31, %v189_v31 }
  0xba   : > { %v196_v36 = vadd.f32 %v194_v33, %v192_v30  ;;  %v195_v38 = vadd.f32 %v193_v34, %v191_v32 }
  0xbc   : > { %v212_v39 = vsel %vm208_vm11, %v196_v36, 0.0  ;;  %v211_v40 = vsel %vm207_vm12, %v195_v38, 0.0  ;;  %221 = sbr.rel (%p306_p7) target bundleno = 384 (0x180), region = 36 }
  0xbd   : > { %v214_v41 = vadd.f32 %v212_v39, %v210_v35  ;;  %v213_v42 = vadd.f32 %v211_v40, %v209_v37 }
  0xbf   : > { %217 = vst.msk [vmem:[#allocation2 + $0x8] sm:$0xff] %vm215_vm13, %v214_v41 }
  0xc0   : > { %216 = vst.msk [vmem:[#allocation2] sm:$0xff] %vm215_vm13, %v213_v42 }
  0xc6   : > { %v223_v44 = vld [vmem:[#allocation2 + $0x8] sm:$0xff] }
  0xc7   : > { %v222_v43 = vld [vmem:[#allocation2] sm:$0xff]  ;;  %v225_v46 = vsel %vm215_vm13, %v223_v44, 0.0 }
  0xc8   : > { %v224_v45 = vsel %vm215_vm13, %v222_v43, 0.0 }
  0xc9   : > { %v226_v47 = vadd.f32 %v225_v46, %v224_v45 }
  0xcb   : > { %227 = vadd.xlane.f32.xlu0 %v226_v47 }
 0x13e   : > { %v228_v48 = vpop.xlane.xlu0 %227 }
 0x13f   : > { %v229_v49 = vrot.slane %v228_v48, 4 }
 0x141   : > { %v230_v50 = vadd.f32 %v229_v49, %v228_v48 }
 0x143   : > { %v231_v51 = vrot.slane %v230_v50, 2 }
 0x145   : > { %v232_v52 = vadd.f32 %v231_v51, %v230_v50 }
 0x147   : > { %v233_v53 = vrot.slane %v232_v52, 1 }
 0x149   : > { %v234_v54 = vadd.f32 %v233_v53, %v232_v52 }
 0x14b   : > { %312 = vpush %v234_v54 }
 0x17c   : > { %s313_s21 = spop %312 }
 0x17d   : > { %s236_s22 = smul.f32 0.00015943877, %s313_s21 }
 0x17f   : > { %238 = sst [smem:[#allocation6]] %s236_s22 }
 0x180 PF: > { %p325_p8 = scmp.eq.s32.totalorder %s488_s10, 3  ;;  %s245_s25 = sshll.u32 %s565_s1, 4  ;;  %s246_s25 = int_to_ptr.hbm [resolvable:$true] %s245_s25 }
 0x181   : > { %s458_s26 = smov [#allocation6]  }
 0x182   : > { %317 = dma.smem_to_hbm (%p325_p8), %s458_s26, 16, %s246_s25, [#allocation5]  }
 0x183   : > { %432 = dma.done.wait (%p325_p8), [#allocation5], 16  }
 0x184   : > { %434 = vsyncadd (%p325_p8), [#allocation5], 4294967280 }
 0x185   : > { %254 = sfence }
 0x186 PF: > { %p12_p9 = scmp.ge.s32.totalorder %s491_s11, 6   ;;  %s569_s6 = smov %s441_s7 }
 0x187   : > { %s570_s7 = smov %s445_s8  ;;  %s571_s8 = smov %s501_s14 }
 0x188   : > { %s572_s9 = smov %s491_s11  ;;  %14 = sbr.rel (!%p12_p9) target bundleno = 4 (0x4), region = 70 }
 0x18d   :  { %260 = vsyncpa [#allocation4], 1 }
 0x18e   :  { %262 = vsyncpa [#allocation4 + $0x1], 1 }
 0x18f   :  { %263 = vsyncpa [#allocation5], 1 }
 0x190   :  { %265 = vsyncpa [#allocation5 + $0x1], 1 }

</bundles_post_ra>
